<compile_context>
chip_gen: v7x
topology: tpu7x:2x2x1
jax: 0.10.0
libtpu: 0.0.40
codegen_flags: <defaults>
</compile_context>

<pallas_src>
import jax
import jax.numpy as jnp
from jax.experimental import pallas as pl
from jax.experimental.pallas import tpu as pltpu

H1, H2 = 256, 128          # fc1 / fc2 widths from the module
LANE = 128
SUBLANE = 8
MAX_TILE_ROWS = 2048       # upper bound on rows per grid step


def _round_up(n, m):
    return ((n + m - 1) // m) * m


def _num_tensorcores():
    """Best-effort TensorCores-per-chip (v7x has 2; v5e/v6e have 1)."""
    try:
        kind = (getattr(jax.devices()[0], "device_kind", "") or "").lower()
        if "v7" in kind or "tpu7" in kind:
            return 2
    except Exception:
        pass
    return 1


def _choose_tile_b(batch, d_in, x_itemsize, num_tc):
    """Pick the batch tile: few grid steps, balanced across TCs, VMEM-safe."""
    # VMEM bytes per tile row: double-buffered x (native dtype) + double-buffered
    # padded f32 out + f32 h1/h2 intermediates + their bf16 MXU copies.
    per_row = (2 * d_in * x_itemsize + 2 * LANE * 4
               + (H1 + H2) * 4 + (H1 + H2) * 2)
    budget = 24 * 1024 * 1024   # stay well under the scoped VMEM default everywhere
    cap = max(SUBLANE,
              min(MAX_TILE_ROWS, (budget // per_row) // SUBLANE * SUBLANE))

    b8 = _round_up(batch, SUBLANE)
    if b8 <= cap:
        # Whole batch fits one tile.  Only split for v7x (2 TCs) when each TC
        # gets >=128 rows to amortize the ~0.35us/step grid overhead; on
        # 1-TC chips a single step is strictly cheaper.
        if num_tc >= 2 and b8 >= num_tc * 128:
            return _round_up(-(-b8 // num_tc), SUBLANE)
        return b8
    # Large batch: balanced grid (step count a multiple of num_tc), padding < 1 tile.
    steps = -(-b8 // cap)
    steps = _round_up(steps, num_tc)
    return _round_up(-(-b8 // steps), SUBLANE)


def _mlp_kernel(x_ref, w1_ref, b1_ref, w2_ref, b2_ref, w3_ref, b3_ref, o_ref):
    # In-kernel bf16 cast of the streamed input (hidden under the pipeline).
    x = x_ref[...].astype(jnp.bfloat16)
    # fc1: bf16 operands -> f32 MXU accumulation; bias + ReLU in f32 (VPU).
    h1 = jnp.dot(x, w1_ref[...], preferred_element_type=jnp.float32)
    h1 = jnp.maximum(h1 + b1_ref[...], 0.0)
    # dropout(p=0.4) -> identity at inference time (model.eval()).
    # fc2
    h2 = jnp.dot(h1.astype(jnp.bfloat16), w2_ref[...],
                 preferred_element_type=jnp.float32)
    h2 = jnp.maximum(h2 + b2_ref[...], 0.0)
    # fc3 (no activation); padded output lanes stay zero (w3/b3 pad is zero).
    out = jnp.dot(h2.astype(jnp.bfloat16), w3_ref[...],
                  preferred_element_type=jnp.float32)
    o_ref[...] = (out + b3_ref[...]).astype(o_ref.dtype)


def prepare_params(params):
    """One-time conversion of module params to the kernel's compute layout.

    Weights -> bf16 (MXU operands), biases -> f32 (f32 epilogue), fc3 columns
    zero-padded up to a 128-lane multiple for a lane-dense output store.
    Call once and reuse the result; avoids re-casting/padding every forward.
    Returns (prepared_params, embedding_dim).
    """
    w1, b1, w2, b2, w3, b3 = params
    d_out = w3.shape[1]
    d_out_p = _round_up(max(d_out, LANE), LANE)
    b3 = b3.reshape(1, -1)
    if d_out_p != d_out:
        w3 = jnp.pad(w3, ((0, 0), (0, d_out_p - d_out)))
        b3 = jnp.pad(b3, ((0, 0), (0, d_out_p - d_out)))
    prepared = (
        w1.astype(jnp.bfloat16), b1.reshape(1, -1).astype(jnp.float32),
        w2.astype(jnp.bfloat16), b2.reshape(1, -1).astype(jnp.float32),
        w3.astype(jnp.bfloat16), b3.astype(jnp.float32),
    )
    return prepared, d_out


def biometric_classifier_forward(x, prepared, d_out, *, tile_b=None, out_dtype=None):
    """Fused 3-layer MLP forward (fc1+relu, dropout[eval], fc2+relu, fc3).

    `prepared` comes from prepare_params().  `out_dtype=jnp.bfloat16` halves the
    (lane-padded) output writeback if downstream tolerates it; default matches x.
    """
    w1, b1, w2, b2, w3, b3 = prepared
    batch, d_in = x.shape
    d_out_p = w3.shape[1]
    out_dtype = x.dtype if out_dtype is None else out_dtype

    num_tc = _num_tensorcores()
    if tile_b is None:
        tile_b = _choose_tile_b(batch, d_in, x.dtype.itemsize, num_tc)
    b_pad = _round_up(batch, tile_b)
    if b_pad != batch:
        x = jnp.pad(x, ((0, b_pad - batch), (0, 0)))   # deterministic zero pad

    out = pl.pallas_call(
        _mlp_kernel,
        out_shape=jax.ShapeDtypeStruct((b_pad, d_out_p), out_dtype),
        grid_spec=pl.GridSpec(
            grid=(b_pad // tile_b,),
            in_specs=[
                # x streamed in its native dtype; bf16 cast happens in-kernel.
                # (If profiling shows this DMA exposed at very large d_in, add
                #  pipeline_mode=pl.Buffered(3) here.)
                pl.BlockSpec((tile_b, d_in), lambda i: (i, 0)),
                pl.BlockSpec((d_in, H1), lambda i: (0, 0)),        # w1 (resident)
                pl.BlockSpec((1, H1), lambda i: (0, 0)),           # b1
                pl.BlockSpec((H1, H2), lambda i: (0, 0)),          # w2
                pl.BlockSpec((1, H2), lambda i: (0, 0)),           # b2
                pl.BlockSpec((H2, d_out_p), lambda i: (0, 0)),     # w3 (lane-padded)
                pl.BlockSpec((1, d_out_p), lambda i: (0, 0)),      # b3 (lane-padded)
            ],
            out_specs=pl.BlockSpec((tile_b, d_out_p), lambda i: (i, 0)),
        ),
        compiler_params=pltpu.CompilerParams(
            dimension_semantics=("parallel",),
        ),
    )(x, w1, b1, w2, b2, w3, b3)

    return out[:batch, :d_out]


def init_params(key, input_dim, embedding_dim=64, dtype=jnp.float32):
    """Deterministic parameter init (Kaiming-uniform-ish, like nn.Linear)."""
    ks = jax.random.split(key, 6)

    def linear(kw, kb, fan_in, fan_out):
        bound = 1.0 / jnp.sqrt(fan_in)
        w = jax.random.uniform(kw, (fan_in, fan_out), dtype, -bound, bound)
        b = jax.random.uniform(kb, (1, fan_out), dtype, -bound, bound)
        return w, b

    w1, b1 = linear(ks[0], ks[1], input_dim, H1)
    w2, b2 = linear(ks[2], ks[3], H1, H2)
    w3, b3 = linear(ks[4], ks[5], H2, embedding_dim)
    return (w1, b1, w2, b2, w3, b3)


def reference_forward(x, params, bf16_operands=True):
    """Pure-JAX reference; optionally mirrors the kernel's bf16 operand casts."""
    w1, b1, w2, b2, w3, b3 = params
    cast = (lambda a: a.astype(jnp.bfloat16)) if bf16_operands else (lambda a: a)
    h1 = jnp.maximum(
        jnp.dot(cast(x), cast(w1), preferred_element_type=jnp.float32) + b1, 0.0)
    h2 = jnp.maximum(
        jnp.dot(cast(h1), cast(w2), preferred_element_type=jnp.float32) + b2, 0.0)
    return jnp.dot(cast(h2), cast(w3), preferred_element_type=jnp.float32) + b3


if __name__ == "__main__":
    key = jax.random.PRNGKey(0)
    k_x, k_p = jax.random.split(key)

    # Small demo shapes consistent with the module.  batch=16 -> a single grid
    # step on 1-TC chips (v5e/v6e); input_dim=32, embedding_dim=64 (padded to
    # 128 lanes inside, sliced back in the wrapper).
    batch, input_dim, embedding_dim = 16, 32, 64
    x = jax.random.normal(k_x, (batch, input_dim), dtype=jnp.float32)
    params = init_params(k_p, input_dim, embedding_dim)

    prepared, d_out = prepare_params(params)   # one-time: bf16 weights + lane pad
    out = biometric_classifier_forward(x, prepared, d_out)
    out = jax.block_until_ready(out)

    assert out.shape == (batch, embedding_dim), out.shape

    # Precision contract: bf16 MXU operands, f32 accumulation/epilogue.
    ref_bf16 = reference_forward(x, params, bf16_operands=True)
    ref_f32 = reference_forward(x, params, bf16_operands=False)
    assert jnp.allclose(out, ref_bf16, atol=1e-3, rtol=1e-3), "mismatch vs bf16 reference"
    assert jnp.allclose(out, ref_f32, atol=5e-2, rtol=5e-2), "mismatch vs f32 reference"

    # TODO(synk): training-mode Dropout(0.4) (pltpu.prng_seed/prng_random_bits mask)
    # is intentionally omitted; this kernel implements model.eval() semantics only.
    print("KERNEL_OK")
</pallas_src>

<mosaic_0001>
module attributes {stable_mosaic.version = 11 : i64} {
  func.func @_mlp_kernel(%arg0: i32, %arg1: memref<16x32xf32, #tpu.memory_space<vmem>>, %arg2: memref<32x256xbf16, #tpu.memory_space<vmem>>, %arg3: memref<1x256xf32, #tpu.memory_space<vmem>>, %arg4: memref<256x128xbf16, #tpu.memory_space<vmem>>, %arg5: memref<1x128xf32, #tpu.memory_space<vmem>>, %arg6: memref<128x128xbf16, #tpu.memory_space<vmem>>, %arg7: memref<1x128xf32, #tpu.memory_space<vmem>>, %arg8: memref<16x128xf32, #tpu.memory_space<vmem>>) attributes {dimension_semantics = [#tpu.dimension_semantics<parallel>], iteration_bounds = array<i64: 1>, scalar_prefetch = 0 : i64, scratch_operands = 0 : i64, tpu.core_type = #tpu.core_type<tc>, window_params = [{transform_indices = @transform_0, window_bounds = array<i64: 16, 32>}, {pipeline_mode = #tpu.pipeline_mode<synchronous>, transform_indices = @transform_1, window_bounds = array<i64: 32, 256>}, {pipeline_mode = #tpu.pipeline_mode<synchronous>, transform_indices = @transform_2, window_bounds = array<i64: 1, 256>}, {pipeline_mode = #tpu.pipeline_mode<synchronous>, transform_indices = @transform_3, window_bounds = array<i64: 256, 128>}, {pipeline_mode = #tpu.pipeline_mode<synchronous>, transform_indices = @transform_4, window_bounds = array<i64: 1, 128>}, {pipeline_mode = #tpu.pipeline_mode<synchronous>, transform_indices = @transform_5, window_bounds = array<i64: 128, 128>}, {pipeline_mode = #tpu.pipeline_mode<synchronous>, transform_indices = @transform_6, window_bounds = array<i64: 1, 128>}, {transform_indices = @transform_7, window_bounds = array<i64: 16, 128>}]} {
    %c0 = arith.constant 0 : index
    %c0_0 = arith.constant 0 : index
    %0 = vector.load %arg1[%c0, %c0_0] : memref<16x32xf32, #tpu.memory_space<vmem>>, vector<16x32xf32>
    %1 = arith.truncf %0 : vector<16x32xf32> to vector<16x32xbf16>
    %c0_1 = arith.constant 0 : index
    %c0_2 = arith.constant 0 : index
    %2 = vector.load %arg2[%c0_1, %c0_2] : memref<32x256xbf16, #tpu.memory_space<vmem>>, vector<32x256xbf16>
    %cst = arith.constant dense<0.000000e+00> : vector<16x256xf32>
    %3 = tpu.matmul %1, %2, %cst {dimension_numbers = #tpu.dot_dimension_numbers<[1], [0], [0], [1], [0, 0, 1, 1], [], []>} : vector<16x32xbf16>, vector<32x256xbf16>, vector<16x256xf32> -> vector<16x256xf32>
    %c0_3 = arith.constant 0 : index
    %c0_4 = arith.constant 0 : index
    %4 = vector.load %arg3[%c0_3, %c0_4] : memref<1x256xf32, #tpu.memory_space<vmem>>, vector<1x256xf32>
    %5 = vector.broadcast %4 : vector<1x256xf32> to vector<16x256xf32>
    %6 = arith.addf %3, %5 : vector<16x256xf32>
    %cst_5 = arith.constant 0.000000e+00 : f32
    %7 = vector.broadcast %cst_5 : f32 to vector<16x256xf32>
    %8 = arith.maximumf %6, %7 : vector<16x256xf32>
    %9 = arith.truncf %8 : vector<16x256xf32> to vector<16x256xbf16>
    %c0_6 = arith.constant 0 : index
    %c0_7 = arith.constant 0 : index
    %10 = vector.load %arg4[%c0_6, %c0_7] : memref<256x128xbf16, #tpu.memory_space<vmem>>, vector<256x128xbf16>
    %cst_8 = arith.constant dense<0.000000e+00> : vector<16x128xf32>
    %11 = tpu.matmul %9, %10, %cst_8 {dimension_numbers = #tpu.dot_dimension_numbers<[1], [0], [0], [1], [0, 0, 1, 1], [], []>} : vector<16x256xbf16>, vector<256x128xbf16>, vector<16x128xf32> -> vector<16x128xf32>
    %c0_9 = arith.constant 0 : index
    %c0_10 = arith.constant 0 : index
    %12 = vector.load %arg5[%c0_9, %c0_10] : memref<1x128xf32, #tpu.memory_space<vmem>>, vector<1x128xf32>
    %13 = vector.broadcast %12 : vector<1x128xf32> to vector<16x128xf32>
    %14 = arith.addf %11, %13 : vector<16x128xf32>
    %cst_11 = arith.constant 0.000000e+00 : f32
    %15 = vector.broadcast %cst_11 : f32 to vector<16x128xf32>
    %16 = arith.maximumf %14, %15 : vector<16x128xf32>
    %17 = arith.truncf %16 : vector<16x128xf32> to vector<16x128xbf16>
    %c0_12 = arith.constant 0 : index
    %c0_13 = arith.constant 0 : index
    %18 = vector.load %arg6[%c0_12, %c0_13] : memref<128x128xbf16, #tpu.memory_space<vmem>>, vector<128x128xbf16>
    %cst_14 = arith.constant dense<0.000000e+00> : vector<16x128xf32>
    %19 = tpu.matmul %17, %18, %cst_14 {dimension_numbers = #tpu.dot_dimension_numbers<[1], [0], [0], [1], [0, 0, 1, 1], [], []>} : vector<16x128xbf16>, vector<128x128xbf16>, vector<16x128xf32> -> vector<16x128xf32>
    %c0_15 = arith.constant 0 : index
    %c0_16 = arith.constant 0 : index
    %20 = vector.load %arg7[%c0_15, %c0_16] : memref<1x128xf32, #tpu.memory_space<vmem>>, vector<1x128xf32>
    %21 = vector.broadcast %20 : vector<1x128xf32> to vector<16x128xf32>
    %22 = arith.addf %19, %21 : vector<16x128xf32>
    %c0_17 = arith.constant 0 : index
    %c0_18 = arith.constant 0 : index
    %23 = vector.load %arg8[%c0_17, %c0_18] : memref<16x128xf32, #tpu.memory_space<vmem>>, vector<16x128xf32>
    tpu.vector_store %arg8[%c0_17, %c0_18], %22 {strides = array<i32>} : memref<16x128xf32, #tpu.memory_space<vmem>>, vector<16x128xf32>,
    return
  }
  func.func @transform_0(%arg0: i32) -> (i32, i32) {
    %c0_i32 = arith.constant 0 : i32
    %c0_i32_0 = arith.constant 0 : i32
    return %arg0, %c0_i32 : i32, i32
  }
  func.func @transform_1(%arg0: i32) -> (i32, i32) {
    %c0_i32 = arith.constant 0 : i32
    %c0_i32_0 = arith.constant 0 : i32
    %c0_i32_1 = arith.constant 0 : i32
    return %c0_i32, %c0_i32_0 : i32, i32
  }
  func.func @transform_2(%arg0: i32) -> (i32, i32) {
    %c0_i32 = arith.constant 0 : i32
    %c0_i32_0 = arith.constant 0 : i32
    %c0_i32_1 = arith.constant 0 : i32
    return %c0_i32, %c0_i32_0 : i32, i32
  }
  func.func @transform_3(%arg0: i32) -> (i32, i32) {
    %c0_i32 = arith.constant 0 : i32
    %c0_i32_0 = arith.constant 0 : i32
    %c0_i32_1 = arith.constant 0 : i32
    return %c0_i32, %c0_i32_0 : i32, i32
  }
  func.func @transform_4(%arg0: i32) -> (i32, i32) {
    %c0_i32 = arith.constant 0 : i32
    %c0_i32_0 = arith.constant 0 : i32
    %c0_i32_1 = arith.constant 0 : i32
    return %c0_i32, %c0_i32_0 : i32, i32
  }
  func.func @transform_5(%arg0: i32) -> (i32, i32) {
    %c0_i32 = arith.constant 0 : i32
    %c0_i32_0 = arith.constant 0 : i32
    %c0_i32_1 = arith.constant 0 : i32
    return %c0_i32, %c0_i32_0 : i32, i32
  }
  func.func @transform_6(%arg0: i32) -> (i32, i32) {
    %c0_i32 = arith.constant 0 : i32
    %c0_i32_0 = arith.constant 0 : i32
    %c0_i32_1 = arith.constant 0 : i32
    return %c0_i32, %c0_i32_0 : i32, i32
  }
  func.func @transform_7(%arg0: i32) -> (i32, i32) {
    %c0_i32 = arith.constant 0 : i32
    %c0_i32_0 = arith.constant 0 : i32
    return %arg0, %c0_i32 : i32, i32
  }
}

</mosaic_0001>

<bundles_post_ra>
// kernel: tpu_custom_call.1
= control target key start
LH: loop header
LB: loop body
LE: loop exit
PB: predicated region body
PF: predicated region fallthrough
CT: control target
= control target key end

     0   :  { %12 = vsyncpa [#allocation3], 0  ;;  %s866_s0 = inlined_call_operand.hbm [shape: f32[16,32], index: 0, kind: input, shape index: {}]   ;;  %s867_s1 = inlined_call_operand.hbm [shape: bf16[32,256], index: 1, kind: input, shape index: {}]   ;;  %s868_s2 = inlined_call_operand.vmem [shape: f32[1,256], index: 2, kind: input, shape index: {}]   ;;  %s869_s3 = inlined_call_operand.hbm [shape: bf16[256,128], index: 3, kind: input, shape index: {}]   ;;  %s870_s4 = inlined_call_operand.vmem [shape: f32[1,128], index: 4, kind: input, shape index: {}]   ;;  %s871_s5 = inlined_call_operand.hbm [shape: bf16[128,128], index: 5, kind: input, shape index: {}]   ;;  %s872_s6 = inlined_call_operand.vmem [shape: f32[1,128], index: 6, kind: input, shape index: {}]   ;;  %s873_s7 = inlined_call_operand.hbm [shape: f32[16,128], index: 7, kind: output, shape index: {}]  }
   0x1   :  { %13 = vsyncpa [#allocation6], 0 }
   0x2   :  { %14 = vsyncpa [#allocation9], 0 }
   0x3   :  { %15 = vsyncpa [#allocation4], 0  ;;  %s729_s24 = smov [#allocation5]   ;;  %s730_s26 = smov [#allocation2]  }
   0x4   :  { %s33_s25 = sshll.u32 %s729_s24, 4  ;;  %s21_s27 = sshll.u32 %s730_s26, 4  ;;  %s34_s25 = int_to_ptr.vmem [resolvable:$true] %s33_s25  ;;  %s781_s27 = int_to_ptr.vmem [resolvable:$true] %s21_s27 }
   0x5   :  { %s611_s30 = scalar_lea.hbm %s867_s1, 512 }
   0x6   :  { %p612_p0 = scmp.ne.s32.totalorder %s867_s1, %s611_s30  ;;  %p615_p1 = scmp.lt.u32.totalorder %s611_s30, %s867_s1 }
   0x8   :  { %p617_p2 = pnand %p615_p1, %p612_p0 }
   0xa   :  { %620 = shalt.err (!%p617_p2)
}
   0xb   :  { %s621_s12 = scalar_lea.vmem %s34_s25, 512  ;;  %p626_p4 = scmp.lt.s32.totalorder %s34_s25, %s34_s25 }
   0xc   :  { %p622_p3 = scmp.ne.s32.totalorder %s34_s25, %s621_s12  ;;  %p627_p5 = scmp.lt.s32.totalorder %s621_s12, %s621_s12 }
   0xe   :  { %p628_p6 = por %p627_p5, %p626_p4 }
  0x10   :  { %p629_p7 = pnand %p628_p6, %p622_p3 }
  0x12   :  { %632 = shalt.err (!%p629_p7)
}
  0x13   :  { %s731_s13 = smov 128   ;;  %s732_s14 = smov 8  }
  0x14   :  { %39 = dma.hbm_to_vmem [thread:$0]  %s867_s1, 512, %s34_s25, [#allocation6], %s731_s13, %s731_s13, %s732_s14  }
  0x15   :  { %s633_s19 = scalar_lea.hbm %s866_s0, 256 }
  0x16   :  { %p634_p8 = scmp.ne.s32.totalorder %s866_s0, %s633_s19  ;;  %p637_p9 = scmp.lt.u32.totalorder %s633_s19, %s866_s0 }
  0x18   :  { %p639_p10 = pnand %p637_p9, %p634_p8 }
  0x1a   :  { %642 = shalt.err (!%p639_p10)
}
  0x1b   :  { %s643_s24 = scalar_lea.vmem %s781_s27, 256  ;;  %p648_p12 = scmp.lt.s32.totalorder %s781_s27, %s781_s27 }
  0x1c   :  { %p644_p11 = scmp.ne.s32.totalorder %s781_s27, %s643_s24  ;;  %p649_p13 = scmp.lt.s32.totalorder %s643_s24, %s643_s24 }
  0x1e   :  { %p650_p0 = por %p649_p13, %p648_p12 }
  0x20   :  { %p651_p1 = pnand %p650_p0, %p644_p11 }
  0x22   :  { %654 = shalt.err (!%p651_p1)
}
  0x23   :  { %27 = dma.hbm_to_vmem [thread:$0]  %s866_s0, 256, %s781_s27, [#allocation3], %s731_s13, %s731_s13, %s732_s14  }
  0x24   :  { %s733_s26 = smov [#allocation7]   ;;  %s655_s8 = scalar_lea.hbm %s869_s3, 2048 }
  0x25   :  { %s47_s28 = sshll.u32 %s733_s26, 4  ;;  %p656_p2 = scmp.ne.s32.totalorder %s869_s3, %s655_s8  ;;  %s48_s28 = int_to_ptr.vmem [resolvable:$true] %s47_s28 }
  0x26   :  { %p659_p3 = scmp.lt.u32.totalorder %s655_s8, %s869_s3 }
  0x28   :  { %p661_p4 = pnand %p659_p3, %p656_p2 }
  0x2a   :  { %664 = shalt.err (!%p661_p4)
}
  0x2b   :  { %s665_s15 = scalar_lea.vmem %s48_s28, 2048  ;;  %p670_p6 = scmp.lt.s32.totalorder %s48_s28, %s48_s28 }
  0x2c   :  { %p666_p5 = scmp.ne.s32.totalorder %s48_s28, %s665_s15  ;;  %p671_p7 = scmp.lt.s32.totalorder %s665_s15, %s665_s15 }
  0x2e   :  { %p672_p8 = por %p671_p7, %p670_p6 }
  0x30   :  { %p673_p9 = pnand %p672_p8, %p666_p5 }
  0x32   :  { %676 = shalt.err (!%p673_p9)
}
  0x33   :  { %s734_s0 = smov 64   ;;  %s735_s27 = smov 4  }
  0x34   :  { %53 = dma.hbm_to_vmem [thread:$0]  %s869_s3, 2048, %s48_s28, [#allocation6], %s734_s0, %s734_s0, %s735_s27  }
  0x35   :  { %s736_s18 = smov [#allocation8]   ;;  %s677_s22 = scalar_lea.hbm %s871_s5, 1024 }
  0x36   :  { %s61_s19 = sshll.u32 %s736_s18, 4  ;;  %p678_p10 = scmp.ne.s32.totalorder %s871_s5, %s677_s22  ;;  %s62_s19 = int_to_ptr.vmem [resolvable:$true] %s61_s19 }
  0x37   :  { %p681_p11 = scmp.lt.u32.totalorder %s677_s22, %s871_s5 }
  0x39   :  { %p683_p12 = pnand %p681_p11, %p678_p10 }
  0x3b   :  { %686 = shalt.err (!%p683_p12)
}
  0x3c   :  { %s687_s26 = scalar_lea.vmem %s62_s19, 1024  ;;  %p692_p0 = scmp.lt.s32.totalorder %s62_s19, %s62_s19 }
  0x3d   :  { %p688_p13 = scmp.ne.s32.totalorder %s62_s19, %s687_s26  ;;  %p693_p1 = scmp.lt.s32.totalorder %s687_s26, %s687_s26 }
  0x3f   :  { %p694_p2 = por %p693_p1, %p692_p0 }
  0x41   :  { %p695_p3 = pnand %p694_p2, %p688_p13 }
  0x43   :  { %698 = shalt.err (!%p695_p3)
}
  0x44   :  { %67 = dma.hbm_to_vmem [thread:$0]  %s871_s5, 1024, %s62_s19, [#allocation9], %s734_s0, %s734_s0, %s735_s27  }
  0x45   :  { %721 = dma.done.wait [#allocation3], 256  }
  0x46   :  { %722 = vsyncadd [#allocation3], 4294967040 }
  0x47   :  { %723 = dma.done.wait [#allocation6], 2560  }
  0x48   :  { %724 = vsyncadd [#allocation6], 4294964736 }
  0x49   :  { %725 = dma.done.wait [#allocation9], 1024  }
  0x4a   :  { %726 = vsyncadd [#allocation9], 4294966272  ;;  %v737_v0 = vmov 0   ;;  %v581_v1 = vld [vmem:[#allocation5 + $0x4] ss:$8 sps:$4 sm:$0xff]   ;;  %v83_v5 = vld [vmem:[#allocation2] sm:$0xff]  ;;  %v92_v30 = vlaneseq }
  0x4b   :  { %158 = vmatprep.mubr.bf16.mxu0 %v737_v0  ;;  %v583_v2 = vld [vmem:[#allocation5] ss:$8 sps:$4 sm:$0xff]   ;;  %126 = vmatprep.subr.bf16.mxu0 %v581_v1  ;;  %v584_v3 = vld [vmem:[#allocation5 + $0x14] ss:$8 sps:$4 sm:$0xff]   ;;  %v586_v4 = vld [vmem:[#allocation5 + $0x10] ss:$8 sps:$4 sm:$0xff]  }
  0x4c   :  { %127 = vmatpush1.bf16.msra.mxu0 %v583_v2  ;;  %v84_v6 = vld [vmem:[#allocation2 + $0x8] sm:$0xff]  ;;  %v587_v7 = vld [vmem:[#allocation7 + $0x40] sm:$0xff]   ;;  %v589_v10 = vld [vmem:[#allocation7 + $0x48] sm:$0xff]   ;;  %vm122_vm0 = vcmask 261120   ;;  %v738_v25 = vmov 0.0   ;;  %v93_v31 = vshrl.u32 %v92_v30, 7 }
  0x4d   :  { %128 = vmatprep.subr.bf16.mxu0 %v584_v3  ;;  %v588_v8 = vld [vmem:[#allocation7] sm:$0xff]   ;;  %v85_v9 = vpack.c.bf16 %v84_v6, %v83_v5  ;;  %518 = vmatprep.subr.bf16.mxu1 %v587_v7  ;;  %v590_v11 = vld [vmem:[#allocation7 + $0x8] sm:$0xff]   ;;  %v591_v12 = vld [vmem:[#allocation7 + $0x50] sm:$0xff]   ;;  %vm739_vm1 = vmmov 0   ;;  %s740_s10 = smov [#allocation10]  }
  0x4e   :  { %519 = vmatpush3.bf16.msra.mxu1 %v588_v8  ;;  %v592_v13 = vld [vmem:[#allocation7 + $0x10] sm:$0xff]   ;;  %v593_v14 = vld [vmem:[#allocation7 + $0x58] sm:$0xff]   ;;  %v595_v16 = vld [vmem:[#allocation7 + $0x60] sm:$0xff]   ;;  %v94_v32 = vsub.s32 0, %v93_v31  ;;  %v98_v34 = vsub.s32 1, %v93_v31  ;;  %s473_s11 = sshll.u32 %s740_s10, 4  ;;  %s474_s11 = int_to_ptr.vmem [resolvable:$true] %s473_s11 }
  0x4f   :  { %520 = vmatprep.subr.bf16.mxu1 %v589_v10  ;;  %v594_v15 = vld [vmem:[#allocation7 + $0x18] sm:$0xff]   ;;  %v596_v17 = vld [vmem:[#allocation7 + $0x20] sm:$0xff]   ;;  %v597_v18 = vld [vmem:[#allocation7 + $0x68] sm:$0xff]   ;;  %p704_p5 = scmp.lt.s32.totalorder %s474_s11, %s474_s11 }
  0x50   :  { %129 = vmatpush1.bf16.msra.mxu0 %v586_v4  ;;  %v598_v19 = vld [vmem:[#allocation7 + $0x28] sm:$0xff]   ;;  %v599_v20 = vld [vmem:[#allocation7 + $0x70] sm:$0xff]   ;;  %v601_v22 = vld [vmem:[#allocation7 + $0x78] sm:$0xff]  }
  0x51   :  { %v600_v21 = vld [vmem:[#allocation7 + $0x30] sm:$0xff]   ;;  %v602_v23 = vld [vmem:[#allocation7 + $0x38] sm:$0xff]   ;;  %v603_v24 = vld [vmem:[#allocation8] sm:$0xff]   ;;  %549 = vmatprep.subr.bf16.mxu0 %v738_v25 }
  0x52   :  { %521 = vmatpush3.bf16.msra.mxu1 %v590_v11  ;;  %v604_v26 = vld [vmem:[#allocation8 + $0x8] sm:$0xff]   ;;  %v605_v27 = vld [vmem:[#allocation8 + $0x10] sm:$0xff]   ;;  %v606_v28 = vld [vmem:[#allocation8 + $0x18] sm:$0xff]  }
  0x53   :  { %491 = vmatmul.mubr.msk.bf16.vlgmr.msra.gmra.mrb[0].mxu0 %vm122_vm0, %v85_v9  ;;  %522 = vmatprep.subr.bf16.mxu1 %v591_v12  ;;  %v607_v29 = vld [vmem:[#allocation8 + $0x20] sm:$0xff]   ;;  %v90_v33 = vld [vmem:[%s868_s2] sm:$0x3]  ;;  %v608_v51 = vld [vmem:[#allocation8 + $0x28] sm:$0xff]  }
  0x54   :  { %550 = vmatpush3.bf16.msra.mxu0 %v603_v24  ;;  %v95_v35 = vrot.slane %v90_v33, %v94_v32  ;;  %v99_v36 = vrot.slane %v90_v33, %v98_v34  ;;  %v609_v52 = vld [vmem:[#allocation8 + $0x30] sm:$0xff]   ;;  %v610_v53 = vld [vmem:[#allocation8 + $0x38] sm:$0xff]   ;;  %565 = vmatprep.mubr.msk.bf16.mxu0 %vm739_vm1, %v738_v25 }
  0x55   :  { %551 = vmatprep.subr.bf16.mxu0 %v738_v25  ;;  %v492_v55 = vld [vmem:[%s870_s4] ss:$0 sm:$0xff]  ;;  %s699_s4 = scalar_lea.vmem %s474_s11, 256 }
  0x56   :  { %523 = vmatpush3.bf16.msra.mxu1 %v592_v13  ;;  %v509_v2 = vld [vmem:[%s872_s6] ss:$0 sm:$0xff]  ;;  %p700_p4 = scmp.ne.s32.totalorder %s474_s11, %s699_s4  ;;  %p705_p6 = scmp.lt.s32.totalorder %s699_s4, %s699_s4 }
  0x57   :  { %524 = vmatprep.subr.bf16.mxu1 %v593_v14 }
  0x58   :  { %552 = vmatpush3.bf16.msra.mxu0 %v604_v26  ;;  %p706_p7 = por %p705_p6, %p704_p5 }
  0x59   :  { %553 = vmatprep.subr.bf16.mxu0 %v738_v25 }
  0x5a   :  { %525 = vmatpush3.bf16.msra.mxu1 %v594_v15  ;;  %p707_p8 = pnand %p706_p7, %p700_p4 }
  0x5b   :  { %526 = vmatprep.subr.bf16.mxu1 %v595_v16 }
  0x5c   :  { %554 = vmatpush3.bf16.msra.mxu0 %v605_v27 }
  0x5d   :  { %555 = vmatprep.subr.bf16.mxu0 %v738_v25 }
  0x5e   :  { %527 = vmatpush3.bf16.msra.mxu1 %v596_v17 }
  0x5f   :  { %528 = vmatprep.subr.bf16.mxu1 %v597_v18 }
  0x60   :  { %556 = vmatpush3.bf16.msra.mxu0 %v606_v28 }
  0x61   :  { %557 = vmatprep.subr.bf16.mxu0 %v738_v25 }
  0x62   :  { %529 = vmatpush3.bf16.msra.mxu1 %v598_v19 }
  0x63   :  { %530 = vmatprep.subr.bf16.mxu1 %v599_v20 }
  0x64   :  { %558 = vmatpush3.bf16.msra.mxu0 %v607_v29 }
  0x65   :  { %559 = vmatprep.subr.bf16.mxu0 %v738_v25 }
  0x66   :  { %531 = vmatpush3.bf16.msra.mxu1 %v600_v21 }
  0x67   :  { %532 = vmatprep.subr.bf16.mxu1 %v601_v22 }
  0x68   :  { %560 = vmatpush3.bf16.msra.mxu0 %v608_v51 }
  0x69   :  { %561 = vmatprep.subr.bf16.mxu0 %v738_v25 }
  0x6a   :  { %533 = vmatpush3.bf16.msra.mxu1 %v602_v23 }
  0x6c   :  { %562 = vmatpush3.bf16.msra.mxu0 %v609_v52 }
  0x6d   :  { %563 = vmatprep.subr.bf16.mxu0 %v738_v25 }
  0x70   :  { %564 = vmatpush3.bf16.msra.mxu0 %v610_v53 }
 0x126   :  { %v160_v37 = vpop.f32.mrb[0].mxu0 }
 0x127   :  { %v161_v38 = vadd.f32 %v160_v37, %v95_v35  ;;  %v162_v39 = vpop.f32.mrb[1].mxu0 }
 0x128   :  { %v163_v40 = vadd.f32 %v162_v39, %v99_v36  ;;  %v164_v41 = vpop.f32.mrb[2].mxu0 }
 0x129   :  { %v165_v42 = vadd.f32 %v164_v41, %v95_v35  ;;  %v166_v43 = vpop.f32.mrb[3].mxu0  ;;  %v169_v45 = vmax.f32 %v161_v38, 0.0 }
 0x12a   :  { %v167_v44 = vadd.f32 %v166_v43, %v99_v36  ;;  %v170_v47 = vmax.f32 %v163_v40, 0.0 }
 0x12b   :  { %v171_v46 = vmax.f32 %v165_v42, 0.0 }
 0x12c   :  { %v172_v48 = vmax.f32 %v167_v44, 0.0 }
 0x12d   :  { %v173_v49 = vpack.c.bf16 %v171_v46, %v169_v45 }
 0x12e   :  { %v174_v50 = vpack.c.bf16 %v172_v48, %v170_v47 }
 0x130   :  { %342 = vmatprep.mubr.bf16.mxu1 %v174_v50 }
 0x131   :  { %343 = vmatmul.mubr.bf16.vlgmr.msra.gmra.mrb[0].mxu1 %v173_v49 }
 0x204   :  { %v534_v54 = vpop.f32.mrb[0].mxu1 }
 0x205   :  { %v535_v56 = vpop.f32.mrb[1].mxu1 }
 0x206   :  { %v536_v57 = vadd.f32 %v535_v56, %v534_v54  ;;  %v537_v58 = vpop.f32.mrb[2].mxu1 }
 0x207   :  { %v538_v59 = vpop.f32.mrb[3].mxu1 }
 0x208   :  { %v345_v60 = vadd.f32 %v536_v57, %v492_v55  ;;  %v539_v61 = vadd.f32 %v538_v59, %v537_v58 }
 0x20a   :  { %v348_v62 = vadd.f32 %v539_v61, %v492_v55  ;;  %v351_v63 = vmax.f32 %v345_v60, 0.0 }
 0x20c   :  { %v352_v0 = vmax.f32 %v348_v62, 0.0 }
 0x20e   :  { %v353_v1 = vpack.c.bf16 %v352_v0, %v351_v63 }
 0x210   :  { %566 = vmatmul.mubr.bf16.vlgmr.msra.gmra.mrb[4].mxu0 %v353_v1 }
 0x2e3   :  { %v459_v3 = vpop.f32.mrb[4].mxu0 }
 0x2e4   :  { %v460_v4 = vadd.f32 %v509_v2, %v459_v3  ;;  %v567_v5 = vpop.f32.mrb[5].mxu0 }
 0x2e5   :  { %v462_v6 = vpop.f32.mrb[6].mxu0 }
 0x2e6   :  { %466 = vst [vmem:[#allocation10] sm:$0xff] %v460_v4  ;;  %v463_v7 = vadd.f32 %v509_v2, %v462_v6  ;;  %v568_v8 = vpop.f32.mrb[7].mxu0 }
 0x2e8   :  { %467 = vst [vmem:[#allocation10 + $0x8] sm:$0xff] %v463_v7 }
 0x2e9   :  { %710 = shalt.err (!%p707_p8)
}
 0x2ea   :  { %s711_s15 = scalar_lea.hbm %s873_s7, 256 }
 0x2eb   :  { %p712_p9 = scmp.ne.s32.totalorder %s873_s7, %s711_s15  ;;  %p715_p10 = scmp.lt.u32.totalorder %s711_s15, %s873_s7 }
 0x2ed   :  { %p717_p11 = pnand %p715_p10, %p712_p9 }
 0x2ef   :  { %720 = shalt.err (!%p717_p11)
}
 0x2f0   :  { %479 = dma.vmem_to_hbm [thread:$0]  %s474_s11, 256, %s873_s7, [#allocation4], %s731_s13, %s731_s13, %s732_s14  }
 0x2f1   :  { %727 = dma.done.wait [#allocation4], 256  }
 0x2f2   :  { %728 = vsyncadd [#allocation4], 4294967040 }
 0x2f3   :  { %483 = vsyncpa [#allocation3], 1 }
 0x2f4   :  { %484 = vsyncpa [#allocation6], 1 }
 0x2f5   :  { %485 = vsyncpa [#allocation9], 1 }
 0x2f6   :  { %486 = vsyncpa [#allocation4], 1 }

</bundles_post_ra>
